<compile_context>
chip_gen: v7x
topology: tpu7x:2x2x1
jax: 0.10.0
libtpu: 0.0.40
codegen_flags: <defaults>
</compile_context>

<pallas_src>
import functools

import jax
import jax.numpy as jnp
from jax.experimental import pallas as pl
from jax.experimental.pallas import tpu as pltpu


def _round_up(a, b):
    return (a + b - 1) // b * b


# --------------------------------------------------------------------------- #
# Kernel
# --------------------------------------------------------------------------- #
def _ffn_kernel(x_ref, w1_ref, b1_ref, w2_ref, b2_ref, g_ref, beta_ref,
                o_ref, ln_ref, acc_ref, *, eps, approximate_gelu):
    """Grid = (row_tiles, d_ff_chunks).  Per (i, k):
         k == 0     : LayerNorm the row tile into ln_ref, zero the accumulator
         every k    : acc += gelu(ln @ W1^T[:, chunk] + b1[chunk]) @ W2^T[chunk, :]
         k == last  : out = acc + b2 + residual(x)
    """
    k = pl.program_id(1)

    @pl.when(k == 0)
    def _init():
        # LayerNorm once per row tile, cached in VMEM across the d_ff chunks.
        # NOTE: padded (all-zero) rows give var=0 -> rsqrt(eps): large but
        # finite and multiplied by 0, so no NaNs; padded rows are sliced off
        # in the wrapper. Do not "fix" this into a NaN path.
        x = x_ref[...].astype(jnp.float32)                       # (tm, d_embed)
        mean = jnp.mean(x, axis=-1, keepdims=True)
        xc = x - mean
        var = jnp.mean(xc * xc, axis=-1, keepdims=True)
        ln = xc * jax.lax.rsqrt(var + eps)
        ln = ln * g_ref[...].astype(jnp.float32) + beta_ref[...].astype(jnp.float32)
        ln_ref[...] = ln.astype(ln_ref.dtype)                    # model dtype -> MXU
        acc_ref[...] = jnp.zeros_like(acc_ref)

    # ---- Linear 1 chunk: (tm, d_embed) @ (d_embed, tk)  [no in-kernel transpose]
    h = jnp.dot(ln_ref[...], w1_ref[...], preferred_element_type=jnp.float32)
    h = h + b1_ref[...].astype(jnp.float32)

    # ---- GELU (exact erf form matches nn.GELU() default) ----
    if approximate_gelu:
        h = jax.nn.gelu(h, approximate=True)                     # tanh -> EUP slot
    else:
        h = 0.5 * h * (1.0 + jax.lax.erf(h * jnp.float32(0.7071067811865476)))

    # ---- Linear 2 chunk: accumulate (tm, tk) @ (tk, d_embed) into f32 scratch ----
    acc_ref[...] += jnp.dot(h.astype(w2_ref.dtype), w2_ref[...],
                            preferred_element_type=jnp.float32)

    @pl.when(k == pl.num_programs(1) - 1)
    def _finalize():
        # Dropout(p=0) is the identity; add bias2 and the pre-LN residual.
        y = acc_ref[...] + b2_ref[...].astype(jnp.float32) + x_ref[...].astype(jnp.float32)
        o_ref[...] = y.astype(o_ref.dtype)


# --------------------------------------------------------------------------- #
# One-time parameter preparation (hoists per-call transposes / reshapes / pads)
# --------------------------------------------------------------------------- #
def prepare_ffn_params(w1, b1, w2, b2, gamma, beta):
    """Convert PyTorch-layout parameters once, at init time.

    w1: (d_ff, d_embed), w2: (d_embed, d_ff)  [nn.Linear layout]
    Returns a dict with pre-transposed weights:
      w1t: (d_ff_pad, stored as (d_embed, d_ff_pad)), w2t: (d_ff_pad, d_embed),
      biases / LN params reshaped to (1, D).
    d_ff is zero-padded up to a 128-multiple for odd sizes; the padded columns
    contribute exactly zero (zero W1 cols, zero b1, zero W2 rows, gelu(0)=0).
    """
    d_ff, d_embed = w1.shape
    w1t = jnp.transpose(w1)                   # (d_embed, d_ff)
    w2t = jnp.transpose(w2)                   # (d_ff, d_embed)
    b1r = b1.reshape(1, d_ff)

    if d_ff > 128 and d_ff % 128 != 0:
        pad = _round_up(d_ff, 128) - d_ff
        w1t = jnp.pad(w1t, ((0, 0), (0, pad)))
        w2t = jnp.pad(w2t, ((0, pad), (0, 0)))
        b1r = jnp.pad(b1r, ((0, 0), (0, pad)))

    return dict(
        w1t=w1t,
        b1=b1r,
        w2t=w2t,
        b2=b2.reshape(1, d_embed),
        gamma=gamma.reshape(1, d_embed),
        beta=beta.reshape(1, d_embed),
    )


# --------------------------------------------------------------------------- #
# Tiling / VMEM heuristics
# --------------------------------------------------------------------------- #
def _vmem_budget_bytes():
    """Safe scoped-VMEM budget. Uses the real capacity when queryable,
    otherwise 48 MiB (safe on v5e/v6e's 128 MiB and v7x's 64 MiB physical)."""
    try:
        cap = pltpu.get_tpu_info().vmem_capacity_bytes
        return int(min(cap * 0.85, 112 * 1024 * 1024))
    except Exception:
        return 48 * 1024 * 1024


def _vmem_estimate(tm, tk, d_embed, x_itemsize, w_itemsize, weight_buffers):
    def tile(r, c, b):  # (8,128)-padded VMEM tile bytes
        return _round_up(max(r, 1), 8) * _round_up(max(c, 1), 128) * b

    est = 0
    est += 2 * tile(tm, d_embed, x_itemsize)                 # x tile (double buf)
    est += 2 * tile(tm, d_embed, x_itemsize)                 # out tile
    est += weight_buffers * tile(d_embed, tk, w_itemsize)    # W1^T chunk
    est += weight_buffers * tile(tk, d_embed, w_itemsize)    # W2^T chunk
    est += 2 * tile(1, tk, 4)                                # b1 chunk
    est += 2 * 3 * tile(1, d_embed, 4)                       # b2, gamma, beta
    est += tile(tm, d_embed, x_itemsize)                     # ln scratch
    est += tile(tm, d_embed, 4)                              # f32 accumulator
    return est


def _select_tk(d_ff, tk_desired):
    if d_ff <= tk_desired:
        return d_ff                                          # full extent, no chunking
    tk = max(128, (tk_desired // 128) * 128)
    while tk > 128 and d_ff % tk != 0:
        tk -= 128
    if d_ff % tk != 0:
        # prepare_ffn_params pads d_ff to a 128-multiple whenever d_ff > 128,
        # so this only happens for unprepared odd sizes. Never fall back to
        # tk = d_ff (VMEM blow-up); demand prepared params instead.
        raise ValueError(
            "d_ff=%d is not 128-aligned; pass params from prepare_ffn_params()." % d_ff)
    return tk


# --------------------------------------------------------------------------- #
# Public wrapper
# --------------------------------------------------------------------------- #
def feed_forward(x, params, *, eps=1e-5, tm=512, tk=512,
                 approximate_gelu=False, weight_buffers=2, min_row_tiles=1,
                 vmem_limit_bytes=None):
    """x: (..., d_embed); params: output of prepare_ffn_params().
    Returns same shape/dtype as x.

    min_row_tiles=2 is recommended on v7x (2 TensorCores) for small-batch /
    decode-shaped inputs so both cores get a row tile; leave at 1 on v5e/v6e
    (splitting only re-streams the weights twice on a single core).
    weight_buffers=3 (pl.Buffered) deepens the weight-chunk DMA pipeline if
    profiling shows exposed DMA; re-check the VMEM budget on v7x first.
    """
    w1t, b1 = params["w1t"], params["b1"]
    w2t, b2 = params["w2t"], params["b2"]
    gamma, beta = params["gamma"], params["beta"]

    orig_shape = x.shape
    d_embed = orig_shape[-1]
    d_ff = w1t.shape[1]                        # possibly pre-padded to 128-multiple

    x2 = x.reshape(-1, d_embed)
    n = x2.shape[0]

    # Sublane packing: 2-byte dtypes pack 16 rows per vreg, 1-byte pack 32.
    isz = jnp.dtype(x.dtype).itemsize
    sub = {1: 32, 2: 16}.get(isz, 8)

    # ---- row tile ----
    tm = _round_up(min(tm, _round_up(n, sub)), sub)
    if min_row_tiles > 1 and n > sub:
        # Cap tm so the "parallel" row axis has >= min_row_tiles tiles (megacore).
        max_tm = _round_up(-(-n // min_row_tiles), sub)
        tm = max(sub, min(tm, max_tm))

    # ---- d_ff chunk ----
    tk = _select_tk(d_ff, tk)

    # ---- VMEM budget: clamp tiles, always pass an explicit limit ----
    w_isz = jnp.dtype(w1t.dtype).itemsize
    budget = vmem_limit_bytes if vmem_limit_bytes is not None else _vmem_budget_bytes()
    while _vmem_estimate(tm, tk, d_embed, isz, w_isz, weight_buffers) > budget:
        if tk >= 256 and d_ff % (tk // 2) == 0:
            tk //= 2
        elif tm > sub:
            tm = max(sub, _round_up(tm // 2, sub))
        else:
            break

    n_pad = _round_up(n, tm)
    if n_pad != n:
        x2 = jnp.pad(x2, ((0, n_pad - n), (0, 0)))

    grid = (n_pad // tm, d_ff // tk)
    n_row_tiles = grid[0]

    kernel = functools.partial(_ffn_kernel, eps=eps, approximate_gelu=approximate_gelu)

    # Weight bytes are re-streamed once per row tile.
    cost = pl.CostEstimate(
        flops=4 * n_pad * d_embed * d_ff,                    # two matmuls, 2 flop/MAC
        transcendentals=n_pad * d_ff,                        # one erf/tanh per hidden elem
        bytes_accessed=int(
            x2.size * isz * 2                                # read x + write out
            + n_row_tiles * (w1t.size + w2t.size) * w_isz    # weights per row tile
            + n_row_tiles * b1.size * b1.dtype.itemsize
            + (b2.size + gamma.size + beta.size) * 4),
    )

    wspec_kwargs = {}
    if weight_buffers > 2:
        wspec_kwargs["pipeline_mode"] = pl.Buffered(weight_buffers)

    out = pl.pallas_call(
        kernel,
        out_shape=jax.ShapeDtypeStruct((n_pad, d_embed), x.dtype),
        grid_spec=pltpu.PrefetchScalarGridSpec(
            num_scalar_prefetch=0,
            grid=grid,
            in_specs=[
                pl.BlockSpec((tm, d_embed), lambda i, k: (i, 0)),              # x rows
                pl.BlockSpec((d_embed, tk), lambda i, k: (0, k), **wspec_kwargs),  # W1^T chunk
                pl.BlockSpec((1, tk),       lambda i, k: (0, k)),              # b1 chunk
                pl.BlockSpec((tk, d_embed), lambda i, k: (k, 0), **wspec_kwargs),  # W2^T chunk
                pl.BlockSpec((1, d_embed),  lambda i, k: (0, 0)),              # b2
                pl.BlockSpec((1, d_embed),  lambda i, k: (0, 0)),              # gamma
                pl.BlockSpec((1, d_embed),  lambda i, k: (0, 0)),              # beta
            ],
            out_specs=pl.BlockSpec((tm, d_embed), lambda i, k: (i, 0)),
            scratch_shapes=[
                pltpu.VMEM((tm, d_embed), x.dtype),      # cached LayerNorm output
                pltpu.VMEM((tm, d_embed), jnp.float32),  # f32 accumulator
            ],
        ),
        compiler_params=pltpu.CompilerParams(
            dimension_semantics=("parallel", "arbitrary"),
            vmem_limit_bytes=int(budget),
        ),
        cost_estimate=cost,
    )(x2, w1t, b1, w2t, b2, gamma, beta)

    return out[:n].reshape(orig_shape)


# --------------------------------------------------------------------------- #
# Demo / correctness check
# --------------------------------------------------------------------------- #
def xavier_uniform(key, shape, gain=1.0, dtype=jnp.float32):
    # shape = (fan_out, fan_in) for nn.Linear weights
    fan_out, fan_in = shape
    a = gain * jnp.sqrt(6.0 / (fan_in + fan_out))
    return jax.random.uniform(key, shape, dtype=dtype, minval=-a, maxval=a)


if __name__ == "__main__":
    batch, seq = 2, 8
    d_embed, d_ff = 32, 64
    eps = 1e-5

    key = jax.random.PRNGKey(0)
    kx, k1, k2 = jax.random.split(key, 3)

    x = jax.random.normal(kx, (batch, seq, d_embed), dtype=jnp.float32)

    # Deterministic init matching FeedForward.init_weights:
    #   linear_with_relu.weight: xavier_uniform, gain=calculate_gain('relu')=sqrt(2)
    #   linear.weight:           xavier_uniform, gain=1
    #   biases: zeros; LayerNorm: weight=1, bias=0.
    w1 = xavier_uniform(k1, (d_ff, d_embed), gain=jnp.sqrt(2.0))
    b1 = jnp.zeros((d_ff,), jnp.float32)
    w2 = xavier_uniform(k2, (d_embed, d_ff), gain=1.0)
    b2 = jnp.zeros((d_embed,), jnp.float32)
    gamma = jnp.ones((d_embed,), jnp.float32)
    beta = jnp.zeros((d_embed,), jnp.float32)

    # One-time parameter preparation (transpose + reshape hoisted out of the
    # per-call path).
    params = prepare_ffn_params(w1, b1, w2, b2, gamma, beta)

    out = feed_forward(x, params, eps=eps)
    out = jax.block_until_ready(out)

    # Pure-JAX reference (eval-mode module semantics; Dropout(p=0) = identity).
    def ref(x):
        mu = jnp.mean(x, axis=-1, keepdims=True)
        var = jnp.mean((x - mu) ** 2, axis=-1, keepdims=True)
        ln = (x - mu) / jnp.sqrt(var + eps) * gamma + beta
        h = ln @ w1.T + b1
        h = 0.5 * h * (1.0 + jax.lax.erf(h / jnp.sqrt(2.0)))
        return h @ w2.T + b2 + x

    assert jnp.allclose(out, ref(x), atol=1e-5, rtol=1e-5), "mismatch vs reference"
    print("KERNEL_OK")
</pallas_src>

<mosaic_0001>
module attributes {stable_mosaic.version = 11 : i64} {
  func.func @_ffn_kernel(%arg0: i32, %arg1: i32, %arg2: memref<16x32xf32, #tpu.memory_space<vmem>>, %arg3: memref<32x64xf32, #tpu.memory_space<vmem>>, %arg4: memref<1x64xf32, #tpu.memory_space<vmem>>, %arg5: memref<64x32xf32, #tpu.memory_space<vmem>>, %arg6: memref<1x32xf32, #tpu.memory_space<vmem>>, %arg7: memref<1x32xf32, #tpu.memory_space<vmem>>, %arg8: memref<1x32xf32, #tpu.memory_space<vmem>>, %arg9: memref<16x32xf32, #tpu.memory_space<vmem>>, %arg10: memref<16x32xf32, #tpu.memory_space<vmem>>, %arg11: memref<16x32xf32, #tpu.memory_space<vmem>>) attributes {dimension_semantics = [#tpu.dimension_semantics<parallel>, #tpu.dimension_semantics<arbitrary>], iteration_bounds = array<i64: 1, 1>, scalar_prefetch = 0 : i64, scratch_operands = 2 : i64, tpu.core_type = #tpu.core_type<tc>, window_params = [{transform_indices = @transform_0, window_bounds = array<i64: 16, 32>}, {transform_indices = @transform_1, window_bounds = array<i64: 32, 64>}, {transform_indices = @transform_2, window_bounds = array<i64: 1, 64>}, {transform_indices = @transform_3, window_bounds = array<i64: 64, 32>}, {pipeline_mode = #tpu.pipeline_mode<synchronous>, transform_indices = @transform_4, window_bounds = array<i64: 1, 32>}, {pipeline_mode = #tpu.pipeline_mode<synchronous>, transform_indices = @transform_5, window_bounds = array<i64: 1, 32>}, {pipeline_mode = #tpu.pipeline_mode<synchronous>, transform_indices = @transform_6, window_bounds = array<i64: 1, 32>}, {transform_indices = @transform_7, window_bounds = array<i64: 16, 32>}]} {
    %c0_i32 = arith.constant 0 : i32
    %0 = arith.cmpi eq, %arg1, %c0_i32 : i32
    %1 = arith.extui %0 : i1 to i32
    %c0_i32_0 = arith.constant 0 : i32
    %2 = arith.cmpi ne, %1, %c0_i32_0 : i32
    scf.if %2 {
      %c0_18 = arith.constant 0 : index
      %c0_19 = arith.constant 0 : index
      %25 = vector.load %arg2[%c0_18, %c0_19] : memref<16x32xf32, #tpu.memory_space<vmem>>, vector<16x32xf32>
      %cst_20 = arith.constant dense<0.000000e+00> : vector<16xf32>
      %26 = vector.multi_reduction <add>, %25, %cst_20 [1] : vector<16x32xf32> to vector<16xf32>
      %27 = vector.shape_cast %26 : vector<16xf32> to vector<16x1xf32>
      %cst_21 = arith.constant 3.200000e+01 : f32
      %28 = vector.broadcast %cst_21 : f32 to vector<16x1xf32>
      %29 = arith.divf %27, %28 : vector<16x1xf32>
      %30 = vector.broadcast %29 : vector<16x1xf32> to vector<16x32xf32>
      %31 = arith.subf %25, %30 : vector<16x32xf32>
      %32 = arith.mulf %31, %31 : vector<16x32xf32>
      %cst_22 = arith.constant dense<0.000000e+00> : vector<16xf32>
      %33 = vector.multi_reduction <add>, %32, %cst_22 [1] : vector<16x32xf32> to vector<16xf32>
      %34 = vector.shape_cast %33 : vector<16xf32> to vector<16x1xf32>
      %cst_23 = arith.constant 3.200000e+01 : f32
      %35 = vector.broadcast %cst_23 : f32 to vector<16x1xf32>
      %36 = arith.divf %34, %35 : vector<16x1xf32>
      %cst_24 = arith.constant 9.99999974E-6 : f32
      %37 = vector.broadcast %cst_24 : f32 to vector<16x1xf32>
      %38 = arith.addf %36, %37 : vector<16x1xf32>
      %39 = math.rsqrt %38 : vector<16x1xf32>
      %40 = vector.broadcast %39 : vector<16x1xf32> to vector<16x32xf32>
      %41 = arith.mulf %31, %40 : vector<16x32xf32>
      %c0_25 = arith.constant 0 : index
      %c0_26 = arith.constant 0 : index
      %42 = vector.load %arg7[%c0_25, %c0_26] : memref<1x32xf32, #tpu.memory_space<vmem>>, vector<1x32xf32>
      %43 = vector.broadcast %42 : vector<1x32xf32> to vector<16x32xf32>
      %44 = arith.mulf %41, %43 : vector<16x32xf32>
      %c0_27 = arith.constant 0 : index
      %c0_28 = arith.constant 0 : index
      %45 = vector.load %arg8[%c0_27, %c0_28] : memref<1x32xf32, #tpu.memory_space<vmem>>, vector<1x32xf32>
      %46 = vector.broadcast %45 : vector<1x32xf32> to vector<16x32xf32>
      %47 = arith.addf %44, %46 : vector<16x32xf32>
      %c0_29 = arith.constant 0 : index
      %c0_30 = arith.constant 0 : index
      %48 = vector.load %arg10[%c0_29, %c0_30] : memref<16x32xf32, #tpu.memory_space<vmem>>, vector<16x32xf32>
      tpu.vector_store %arg10[%c0_29, %c0_30], %47 {strides = array<i32>} : memref<16x32xf32, #tpu.memory_space<vmem>>, vector<16x32xf32>,
      %cst_31 = arith.constant 0.000000e+00 : f32
      %49 = vector.broadcast %cst_31 : f32 to vector<16x32xf32>
      %c0_32 = arith.constant 0 : index
      %c0_33 = arith.constant 0 : index
      %50 = vector.load %arg11[%c0_32, %c0_33] : memref<16x32xf32, #tpu.memory_space<vmem>>, vector<16x32xf32>
      tpu.vector_store %arg11[%c0_32, %c0_33], %49 {strides = array<i32>} : memref<16x32xf32, #tpu.memory_space<vmem>>, vector<16x32xf32>,
    } else {
    }
    %c0 = arith.constant 0 : index
    %c0_1 = arith.constant 0 : index
    %3 = vector.load %arg10[%c0, %c0_1] : memref<16x32xf32, #tpu.memory_space<vmem>>, vector<16x32xf32>
    %c0_2 = arith.constant 0 : index
    %c0_3 = arith.constant 0 : index
    %4 = vector.load %arg3[%c0_2, %c0_3] : memref<32x64xf32, #tpu.memory_space<vmem>>, vector<32x64xf32>
    %cst = arith.constant dense<0.000000e+00> : vector<16x64xf32>
    %5 = tpu.matmul %3, %4, %cst {dimension_numbers = #tpu.dot_dimension_numbers<[1], [0], [0], [1], [0, 0, 1, 1], [], []>} : vector<16x32xf32>, vector<32x64xf32>, vector<16x64xf32> -> vector<16x64xf32>
    %c0_4 = arith.constant 0 : index
    %c0_5 = arith.constant 0 : index
    %6 = vector.load %arg4[%c0_4, %c0_5] : memref<1x64xf32, #tpu.memory_space<vmem>>, vector<1x64xf32>
    %7 = vector.broadcast %6 : vector<1x64xf32> to vector<16x64xf32>
    %8 = arith.addf %5, %7 : vector<16x64xf32>
    %cst_6 = arith.constant 5.000000e-01 : f32
    %9 = vector.broadcast %cst_6 : f32 to vector<16x64xf32>
    %10 = arith.mulf %9, %8 : vector<16x64xf32>
    %cst_7 = arith.constant 0.707106769 : f32
    %11 = vector.broadcast %cst_7 : f32 to vector<16x64xf32>
    %12 = arith.mulf %8, %11 : vector<16x64xf32>
    %13 = math.erf %12 : vector<16x64xf32>
    %cst_8 = arith.constant 1.000000e+00 : f32
    %14 = vector.broadcast %cst_8 : f32 to vector<16x64xf32>
    %15 = arith.addf %14, %13 : vector<16x64xf32>
    %16 = arith.mulf %10, %15 : vector<16x64xf32>
    %c0_9 = arith.constant 0 : index
    %c0_10 = arith.constant 0 : index
    %17 = vector.load %arg11[%c0_9, %c0_10] : memref<16x32xf32, #tpu.memory_space<vmem>>, vector<16x32xf32>
    %c0_11 = arith.constant 0 : index
    %c0_12 = arith.constant 0 : index
    %18 = vector.load %arg5[%c0_11, %c0_12] : memref<64x32xf32, #tpu.memory_space<vmem>>, vector<64x32xf32>
    %cst_13 = arith.constant dense<0.000000e+00> : vector<16x32xf32>
    %19 = tpu.matmul %16, %18, %cst_13 {dimension_numbers = #tpu.dot_dimension_numbers<[1], [0], [0], [1], [0, 0, 1, 1], [], []>} : vector<16x64xf32>, vector<64x32xf32>, vector<16x32xf32> -> vector<16x32xf32>
    %20 = arith.addf %17, %19 : vector<16x32xf32>
    %c0_14 = arith.constant 0 : index
    %c0_15 = arith.constant 0 : index
    %21 = vector.load %arg11[%c0_14, %c0_15] : memref<16x32xf32, #tpu.memory_space<vmem>>, vector<16x32xf32>
    tpu.vector_store %arg11[%c0_14, %c0_15], %20 {strides = array<i32>} : memref<16x32xf32, #tpu.memory_space<vmem>>, vector<16x32xf32>,
    %c0_i32_16 = arith.constant 0 : i32
    %22 = arith.cmpi eq, %arg1, %c0_i32_16 : i32
    %23 = arith.extui %22 : i1 to i32
    %c0_i32_17 = arith.constant 0 : i32
    %24 = arith.cmpi ne, %23, %c0_i32_17 : i32
    scf.if %24 {
      %c0_18 = arith.constant 0 : index
      %c0_19 = arith.constant 0 : index
      %25 = vector.load %arg11[%c0_18, %c0_19] : memref<16x32xf32, #tpu.memory_space<vmem>>, vector<16x32xf32>
      %c0_20 = arith.constant 0 : index
      %c0_21 = arith.constant 0 : index
      %26 = vector.load %arg6[%c0_20, %c0_21] : memref<1x32xf32, #tpu.memory_space<vmem>>, vector<1x32xf32>
      %27 = vector.broadcast %26 : vector<1x32xf32> to vector<16x32xf32>
      %28 = arith.addf %25, %27 : vector<16x32xf32>
      %c0_22 = arith.constant 0 : index
      %c0_23 = arith.constant 0 : index
      %29 = vector.load %arg2[%c0_22, %c0_23] : memref<16x32xf32, #tpu.memory_space<vmem>>, vector<16x32xf32>
      %30 = arith.addf %28, %29 : vector<16x32xf32>
      %c0_24 = arith.constant 0 : index
      %c0_25 = arith.constant 0 : index
      %31 = vector.load %arg9[%c0_24, %c0_25] : memref<16x32xf32, #tpu.memory_space<vmem>>, vector<16x32xf32>
      tpu.vector_store %arg9[%c0_24, %c0_25], %30 {strides = array<i32>} : memref<16x32xf32, #tpu.memory_space<vmem>>, vector<16x32xf32>,
    } else {
    }
    return
  }
  func.func @transform_0(%arg0: i32, %arg1: i32) -> (i32, i32) {
    %c0_i32 = arith.constant 0 : i32
    %c0_i32_0 = arith.constant 0 : i32
    return %arg0, %c0_i32 : i32, i32
  }
  func.func @transform_1(%arg0: i32, %arg1: i32) -> (i32, i32) {
    %c0_i32 = arith.constant 0 : i32
    %c0_i32_0 = arith.constant 0 : i32
    return %c0_i32, %arg1 : i32, i32
  }
  func.func @transform_2(%arg0: i32, %arg1: i32) -> (i32, i32) {
    %c0_i32 = arith.constant 0 : i32
    %c0_i32_0 = arith.constant 0 : i32
    return %c0_i32, %arg1 : i32, i32
  }
  func.func @transform_3(%arg0: i32, %arg1: i32) -> (i32, i32) {
    %c0_i32 = arith.constant 0 : i32
    %c0_i32_0 = arith.constant 0 : i32
    return %arg1, %c0_i32 : i32, i32
  }
  func.func @transform_4(%arg0: i32, %arg1: i32) -> (i32, i32) {
    %c0_i32 = arith.constant 0 : i32
    %c0_i32_0 = arith.constant 0 : i32
    %c0_i32_1 = arith.constant 0 : i32
    return %c0_i32, %c0_i32_0 : i32, i32
  }
  func.func @transform_5(%arg0: i32, %arg1: i32) -> (i32, i32) {
    %c0_i32 = arith.constant 0 : i32
    %c0_i32_0 = arith.constant 0 : i32
    %c0_i32_1 = arith.constant 0 : i32
    return %c0_i32, %c0_i32_0 : i32, i32
  }
  func.func @transform_6(%arg0: i32, %arg1: i32) -> (i32, i32) {
    %c0_i32 = arith.constant 0 : i32
    %c0_i32_0 = arith.constant 0 : i32
    %c0_i32_1 = arith.constant 0 : i32
    return %c0_i32, %c0_i32_0 : i32, i32
  }
  func.func @transform_7(%arg0: i32, %arg1: i32) -> (i32, i32) {
    %c0_i32 = arith.constant 0 : i32
    %c0_i32_0 = arith.constant 0 : i32
    return %arg0, %c0_i32 : i32, i32
  }
}

</mosaic_0001>

<bundles_post_ra>
// kernel: tpu_custom_call.1
= control target key start
LH: loop header
LB: loop body
LE: loop exit
PB: predicated region body
PF: predicated region fallthrough
CT: control target
= control target key end

     0   :  { %vm33_vm0 = vcmask 261120   ;;  %s568_s0 = inlined_call_operand.vmem [shape: f32[16,32], index: 0, kind: input, shape index: {}]   ;;  %s569_s1 = inlined_call_operand.vmem [shape: f32[32,64], index: 1, kind: input, shape index: {}]   ;;  %s570_s2 = inlined_call_operand.vmem [shape: f32[1,64], index: 2, kind: input, shape index: {}]   ;;  %s571_s3 = inlined_call_operand.vmem [shape: f32[64,32], index: 3, kind: input, shape index: {}]   ;;  %s572_s4 = inlined_call_operand.vmem [shape: f32[1,32], index: 4, kind: input, shape index: {}]   ;;  %s573_s5 = inlined_call_operand.vmem [shape: f32[1,32], index: 5, kind: input, shape index: {}]   ;;  %s574_s6 = inlined_call_operand.vmem [shape: f32[1,32], index: 6, kind: input, shape index: {}]   ;;  %s575_s7 = inlined_call_operand.hbm [shape: f32[16,32], index: 7, kind: output, shape index: {}]  }
   0x1   :  { %v481_v0 = vld [vmem:[%s568_s0] sm:$0xff]  ;;  %v486_v1 = vld [vmem:[%s568_s0 + $0x8] sm:$0xff] }
   0x2   :  { %12 = vsyncpa [#allocation5], 0  ;;  %v34_v2 = vsel %vm33_vm0, %v481_v0, 0.0  ;;  %v37_v3 = vsel %vm33_vm0, %v486_v1, 0.0  ;;  %v85_v14 = vld [vmem:[%s569_s1] sm:$0xff]  ;;  %v86_v15 = vld [vmem:[%s569_s1 + $0x8] sm:$0xff] }
   0x3   :  { %35 = vadd.xlane.f32.xlu0 %v34_v2  ;;  %v374_v16 = vpack.c.bf16 %v86_v15, %v85_v14  ;;  %v87_v17 = vld [vmem:[%s569_s1 + $0x10] sm:$0xff]  ;;  %v88_v18 = vld [vmem:[%s569_s1 + $0x18] sm:$0xff]  ;;  %v320_v27 = vld [vmem:[%s573_s5] ss:$0 sm:$0xff]  ;;  %v434_v50 = vmov 0.0   ;;  %vm198_vm1 = vcmask 523264  }
   0x4   :  { %v378_v19 = vpack.c.bf16 %v88_v18, %v87_v17  ;;  %v321_v29 = vld [vmem:[%s574_s6] ss:$0 sm:$0xff]  ;;  %v191_v39 = vld [vmem:[%s571_s3 + $0x8] sm:$0xff]  ;;  %v192_v41 = vld [vmem:[%s571_s3 + $0x10] sm:$0xff]  ;;  %82 = vst.msk [vmem:[#allocation3 + $0x8] sm:$0xff] %vm33_vm0, %v434_v50  ;;  %s435_s30 = smov [#allocation4]  }
   0x5   :  { %375 = vmatprep.subr.bf16.mxu0 %v374_v16  ;;  %v190_v38 = vld [vmem:[%s571_s3] sm:$0xff]  ;;  %v193_v42 = vld [vmem:[%s571_s3 + $0x18] sm:$0xff]  ;;  %v195_v45 = vld [vmem:[%s571_s3 + $0x28] sm:$0xff]  ;;  %81 = vst.msk [vmem:[#allocation3] sm:$0xff] %vm33_vm0, %v434_v50  ;;  %s309_s8 = sshll.u32 %s435_s30, 4  ;;  %s310_s8 = int_to_ptr.vmem [resolvable:$true] %s309_s8 }
   0x6   :  { %377 = vmatpush3.bf16.msra.mxu0 %v374_v16  ;;  %v382_v40 = vpack.c.bf16 %v191_v39, %v190_v38  ;;  %v386_v43 = vpack.c.bf16 %v193_v42, %v192_v41  ;;  %v194_v44 = vld [vmem:[%s571_s3 + $0x20] sm:$0xff]  ;;  %v196_v47 = vld [vmem:[%s571_s3 + $0x30] sm:$0xff]  ;;  %v197_v48 = vld [vmem:[%s571_s3 + $0x38] sm:$0xff]  ;;  %s410_s9 = scalar_lea.vmem %s310_s8, 256  ;;  %p415_p1 = scmp.lt.s32.totalorder %s310_s8, %s310_s8 }
   0x7   :  { %38 = vadd.xlane.f32.xlu0 %v37_v3  ;;  %379 = vmatprep.subr.bf16.mxu0 %v378_v19  ;;  %v390_v46 = vpack.c.bf16 %v195_v45, %v194_v44  ;;  %v394_v49 = vpack.c.bf16 %v197_v48, %v196_v47  ;;  %v322_v51 = vld [vmem:[%s570_s2] ss:$0 sm:$0xff]  ;;  %p411_p0 = scmp.ne.s32.totalorder %s310_s8, %s410_s9  ;;  %p416_p2 = scmp.lt.s32.totalorder %s410_s9, %s410_s9 }
   0x8   :  { %383 = vmatprep.subr.bf16.mxu1 %v382_v40 }
   0x9   :  { %385 = vmatpush3.bf16.msra.mxu1 %v382_v40  ;;  %p417_p3 = por %p416_p2, %p415_p1 }
   0xa   :  { %381 = vmatpush3.bf16.msra.mxu0 %v378_v19  ;;  %387 = vmatprep.subr.bf16.mxu1 %v386_v43 }
   0xb   :  { %p418_p4 = pnand %p417_p3, %p411_p0 }
   0xd   :  { %389 = vmatpush3.bf16.msra.mxu1 %v386_v43 }
   0xe   :  { %391 = vmatprep.subr.bf16.mxu1 %v390_v46 }
  0x11   :  { %393 = vmatpush3.bf16.msra.mxu1 %v390_v46 }
  0x12   :  { %395 = vmatprep.subr.bf16.mxu1 %v394_v49 }
  0x15   :  { %397 = vmatpush3.bf16.msra.mxu1 %v394_v49 }
  0x90   :  { %v36_v4 = vpop.xlane.xlu0 %35 }
  0x91   :  { %v41_v5 = vmul.f32 0.03125, %v36_v4  ;;  %v189_v4 = vld [vmem:[#allocation3 + $0x8] sm:$0xff] }
  0x93   :  { %v43_v6 = vsub.f32 %v481_v0, %v41_v5  ;;  %v188_v5 = vld [vmem:[#allocation3] sm:$0xff] }
  0x94   :  { %v39_v7 = vpop.xlane.xlu0 %38 }
  0x95   :  { %v42_v8 = vmul.f32 0.03125, %v39_v7  ;;  %v45_v9 = vmul.f32 %v43_v6, %v43_v6 }
  0x97   :  { %v44_v10 = vsub.f32 %v486_v1, %v42_v8  ;;  %v47_v11 = vsel %vm33_vm0, %v45_v9, 0.0 }
  0x98   :  { %48 = vadd.xlane.f32.xlu1 %v47_v11 }
  0x99   :  { %v46_v12 = vmul.f32 %v44_v10, %v44_v10 }
  0x9b   :  { %v50_v13 = vsel %vm33_vm0, %v46_v12, 0.0 }
  0x9c   :  { %51 = vadd.xlane.f32.xlu1 %v50_v13 }
 0x125   :  { %v49_v20 = vpop.xlane.xlu1 %48 }
 0x126   :  { %v53_v21 = vmul.f32 0.03125, %v49_v20 }
 0x128   :  { %v55_v22 = vadd.f32 1e-05, %v53_v21 }
 0x129   :  { %v52_v23 = vpop.xlane.xlu1 %51 }
 0x12a   :  { %402 = vrsqrt.f32 %v55_v22  ;;  %v54_v24 = vmul.f32 0.03125, %v52_v23 }
 0x12c   :  { %v56_v25 = vadd.f32 1e-05, %v54_v24 }
 0x12e   :  { %404 = vrsqrt.f32 %v56_v25 }
 0x134   :  { %v403_v26 = vpop.eup %402 }
 0x135   :  { %v59_v28 = vmul.f32 %v403_v26, %v43_v6 }
 0x137   :  { %v68_v30 = vmul.f32 %v320_v27, %v59_v28 }
 0x138   :  { %v405_v31 = vpop.eup %404 }
 0x139   :  { %v77_v32 = vadd.f32 %v321_v29, %v68_v30  ;;  %v60_v33 = vmul.f32 %v405_v31, %v44_v10  ;;  %v327_v10 = vld [vmem:[%s572_s4] ss:$0 sm:$0xff] }
 0x13b   :  { %79 = vst.msk [vmem:[#allocation2] sm:$0xff] %vm33_vm0, %v77_v32  ;;  %v69_v34 = vmul.f32 %v320_v27, %v60_v33 }
 0x13d   :  { %v78_v35 = vadd.f32 %v321_v29, %v69_v34 }
 0x13f   :  { %80 = vst.msk [vmem:[#allocation2 + $0x8] sm:$0xff] %vm33_vm0, %v78_v35 }
 0x142   :  { %v83_v36 = vld [vmem:[#allocation2] sm:$0xff] }
 0x143   :  { %352 = vmatprep.mubr.msk.f32.mxu0 %vm33_vm0, %v83_v36 }
 0x146   :  { %v84_v37 = vld [vmem:[#allocation2 + $0x8] sm:$0xff] }
 0x147   :  { %353 = vmatmul.mubr.msk.f32.vlgmr.msra.gmra.mrb[0].mxu0 %vm33_vm0, %v84_v37 }
 0x21a   :  { %v354_v52 = vpop.f32.mrb[0].mxu0 }
 0x21b   :  { %v175_v53 = vadd.f32 %v354_v52, %v322_v51  ;;  %v169_v54 = vpop.f32.mrb[1].mxu0 }
 0x21c   :  { %v170_v55 = vadd.f32 %v322_v51, %v169_v54 }
 0x21d   :  { %v181_v56 = vmul.f32 0.70710677, %v175_v53  ;;  %v179_v63 = vmul.f32 0.5, %v175_v53 }
 0x21e   :  { %v180_v57 = vmul.f32 0.70710677, %v170_v55  ;;  %v178_v61 = vmul.f32 0.5, %v170_v55 }
 0x21f   :  { %406 = verf.f32 %v181_v56 }
 0x220   :  { %408 = verf.f32 %v180_v57 }
 0x229   :  { %v407_v58 = vpop.eup %406 }
 0x22a   :  { %v409_v59 = vpop.eup %408  ;;  %v185_v60 = vadd.f32 1.0, %v407_v58 }
 0x22b   :  { %v184_v62 = vadd.f32 1.0, %v409_v59 }
 0x22c   :  { %v187_v3 = vmul.f32 %v185_v60, %v179_v63 }
 0x22d   :  { %v186_v2 = vmul.f32 %v184_v62, %v178_v61 }
 0x22f   :  { %371 = vmatprep.mubr.msk.f32.mxu1 %vm198_vm1, %v186_v2 }
 0x230   :  { %372 = vmatmul.mubr.msk.f32.vlgmr.msra.gmra.mrb[0].mxu1 %vm198_vm1, %v187_v3 }
 0x303   :  { %v373_v6 = vpop.f32.mrb[0].mxu1 }
 0x304   :  { %v281_v7 = vadd.f32 %v373_v6, %v189_v4  ;;  %v271_v8 = vpop.f32.mrb[1].mxu1 }
 0x305   :  { %v280_v9 = vadd.f32 %v271_v8, %v188_v5 }
 0x306   :  { %283 = vst.msk [vmem:[#allocation3 + $0x8] sm:$0xff] %vm33_vm0, %v281_v7 }
 0x307   :  { %282 = vst.msk [vmem:[#allocation3] sm:$0xff] %vm33_vm0, %v280_v9 }
 0x30d   :  { %v288_v11 = vld [vmem:[#allocation3 + $0x8] sm:$0xff] }
 0x30e   :  { %v287_v12 = vld [vmem:[#allocation3] sm:$0xff]  ;;  %v297_v13 = vadd.f32 %v327_v10, %v288_v11 }
 0x30f   :  { %v296_v14 = vadd.f32 %v327_v10, %v287_v12 }
 0x310   :  { %v301_v15 = vadd.f32 %v297_v13, %v486_v1 }
 0x311   :  { %v300_v16 = vadd.f32 %v296_v14, %v481_v0 }
 0x312   :  { %303 = vst.msk [vmem:[#allocation4 + $0x8] sm:$0xff] %vm33_vm0, %v301_v15 }
 0x313   :  { %302 = vst.msk [vmem:[#allocation4] sm:$0xff] %vm33_vm0, %v300_v16 }
 0x314   :  { %421 = shalt.err (!%p418_p4)
}
 0x315   :  { %s422_s11 = scalar_lea.hbm %s575_s7, 256 }
 0x316   :  { %p423_p5 = scmp.ne.s32.totalorder %s575_s7, %s422_s11  ;;  %p426_p6 = scmp.lt.u32.totalorder %s422_s11, %s575_s7 }
 0x318   :  { %p428_p7 = pnand %p426_p6, %p423_p5 }
 0x31a   :  { %431 = shalt.err (!%p428_p7)
}
 0x31b   :  { %s436_s5 = smov 128   ;;  %s437_s15 = smov 8  }
 0x31c   :  { %315 = dma.vmem_to_hbm [thread:$0]  %s310_s8, 256, %s575_s7, [#allocation5], %s436_s5, %s436_s5, %s437_s15  }
 0x31d   :  { %432 = dma.done.wait [#allocation5], 256  }
 0x31e   :  { %433 = vsyncadd [#allocation5], 4294967040 }
 0x31f   :  { %319 = vsyncpa [#allocation5], 1 }

</bundles_post_ra>
